<compile_context>
chip_gen: v7x
topology: tpu7x:2x2x1
jax: 0.10.0
libtpu: 0.0.40
codegen_flags: <defaults>
</compile_context>

<pallas_src>
from functools import partial

import jax
import jax.numpy as jnp
from jax.experimental import pallas as pl
from jax.experimental.pallas import tpu as pltpu

EPS = 1e-5


def _round_up(x, m):
    return ((x + m - 1) // m) * m


# ---------------------------------------------------------------------------
# Fused (bf16 matmul) + bias (+ residual) (+ ReLU) Pallas kernel
# ---------------------------------------------------------------------------
def _make_mm_kernel(relu, has_res):
    def _epilogue(acc, c_ref, r_ref, o_ref):
        y = acc + c_ref[...]                       # folded BatchNorm bias
        if has_res:
            y = y + r_ref[...]                     # residual / downsample branch
        if relu:
            y = jnp.maximum(y, 0.0)
        o_ref[...] = y.astype(o_ref.dtype)

    if has_res:
        def kernel(a_ref, b_ref, c_ref, r_ref, o_ref):
            acc = jnp.dot(a_ref[...], b_ref[...],
                          preferred_element_type=jnp.float32)
            _epilogue(acc, c_ref, r_ref, o_ref)
    else:
        def kernel(a_ref, b_ref, c_ref, o_ref):
            acc = jnp.dot(a_ref[...], b_ref[...],
                          preferred_element_type=jnp.float32)
            _epilogue(acc, c_ref, None, o_ref)
    return kernel


@partial(jax.jit, static_argnames=("relu", "n_out"))
def fused_matmul_bias(a, b_pad, bias_pad, residual, relu, n_out):
    """out = relu?((a @ b_pad) + bias_pad (+ residual)) in a single Pallas kernel.

    a        : (M, K)   activations (im2col matrix), any float dtype -> cast to bf16
    b_pad    : (Kp, Np) bfloat16 weights, BN scale already folded, zero-padded
    bias_pad : (1, Np)  float32 folded BN bias
    residual : optional (M, n_out) float32
    """
    M, K = a.shape
    Kp, Np = b_pad.shape

    Mp = _round_up(M, 8)
    tm = Mp if Mp <= 512 else 512          # keep >=2 parallel M blocks for large M
    Mp = _round_up(Mp, tm)
    tn = 256 if Np >= 1024 else min(Np, 128)   # 256 matches v6e/v7x MXU; keep >=2 blocks

    a_p = jnp.pad(a.astype(jnp.bfloat16), ((0, Mp - M), (0, Kp - K)))

    has_res = residual is not None
    in_specs = [
        pl.BlockSpec((tm, Kp), lambda i, j: (i, 0)),   # full-K A tile
        pl.BlockSpec((Kp, tn), lambda i, j: (0, j)),   # full-K weight slab (streams once)
        pl.BlockSpec((1, tn), lambda i, j: (0, j)),    # bias
    ]
    args = [a_p, b_pad, bias_pad]
    if has_res:
        r_p = jnp.pad(residual,
                      ((0, Mp - residual.shape[0]), (0, Np - residual.shape[1])))
        in_specs.append(pl.BlockSpec((tm, tn), lambda i, j: (i, j)))
        args.append(r_p)

    out = pl.pallas_call(
        _make_mm_kernel(relu, has_res),
        out_shape=jax.ShapeDtypeStruct((Mp, Np), jnp.float32),
        grid_spec=pltpu.PrefetchScalarGridSpec(
            num_scalar_prefetch=0,
            grid=(Mp // tm, Np // tn),
            in_specs=in_specs,
            out_specs=pl.BlockSpec((tm, tn), lambda i, j: (i, j)),
        ),
        compiler_params=pltpu.CompilerParams(
            dimension_semantics=("parallel", "parallel")),
    )(*args)
    return out[:M, :n_out]


# ---------------------------------------------------------------------------
# Conv2d + folded BN (+ReLU) (+residual) via im2col + fused Pallas matmul
# ---------------------------------------------------------------------------
def _im2col(x, kh, kw, stride, padding):
    # x: (N, H, W, C) -> (N*Ho*Wo, kh*kw*C), tap-major (di, dj, c) with c fastest.
    N, H, W, C = x.shape
    Ho = (H + 2 * padding - kh) // stride + 1
    Wo = (W + 2 * padding - kw) // stride + 1
    if kh == 1 and kw == 1 and padding == 0:           # 1x1 conv: pure reshape
        xs = x[:, ::stride, ::stride, :]
        return xs.reshape(N * Ho * Wo, C), (N, Ho, Wo)
    xp = jnp.pad(x, ((0, 0), (padding, padding), (padding, padding), (0, 0)))
    cols = []
    for di in range(kh):
        for dj in range(kw):
            cols.append(xp[:, di:di + stride * (Ho - 1) + 1:stride,
                           dj:dj + stride * (Wo - 1) + 1:stride, :])
    patches = jnp.concatenate(cols, axis=-1)
    return patches.reshape(N * Ho * Wo, kh * kw * C), (N, Ho, Wo)


def conv_bn_act(x, cp, stride=1, padding=0, relu=True, residual=None):
    # cp = (b_pad [bf16, scale folded], bias_pad [f32], cout, kh, kw)
    b_pad, bias_pad, cout, kh, kw = cp
    # Cast to bf16 BEFORE patch extraction so the materialized im2col tensor is half-size.
    a, (N, Ho, Wo) = _im2col(x.astype(jnp.bfloat16), kh, kw, stride, padding)
    M = N * Ho * Wo
    res2d = None if residual is None else residual.reshape(M, cout)
    out = fused_matmul_bias(a, b_pad, bias_pad, res2d, relu=relu, n_out=cout)
    return out.reshape(N, Ho, Wo, cout)


# ---------------------------------------------------------------------------
# MaxPool2d(kernel=3, stride=2, padding=1): single-input, lane-dense Pallas kernel
# ---------------------------------------------------------------------------
@jax.jit
def maxpool_3x3_s2(x):
    N, H, W, C = x.shape
    Ho = (H + 2 - 3) // 2 + 1
    Wo = (W + 2 - 3) // 2 + 1
    xp = jnp.pad(x, ((0, 0), (1, 1), (1, 1), (0, 0)), constant_values=-jnp.inf)
    taps = []
    for di in range(3):
        for dj in range(3):
            taps.append(xp[:, di:di + 2 * (Ho - 1) + 1:2,
                           dj:dj + 2 * (Wo - 1) + 1:2, :].reshape(-1))
    flat = jnp.stack(taps, axis=0)                       # (9, N*Ho*Wo*C)
    total = N * Ho * Wo * C

    # Lane-dense layout: rows of 128 elements (C=64 alone would give masked stores).
    rows = pl.cdiv(total, 128)
    tm = min(512, _round_up(rows, 8))
    rows_p = _round_up(rows, tm)
    flat = jnp.pad(flat, ((0, 0), (0, rows_p * 128 - total)),
                   constant_values=-jnp.inf)
    stacked = flat.reshape(9, rows_p, 128)

    def kernel(t_ref, o_ref):
        m = t_ref[0]
        for t in range(1, 9):
            m = jnp.maximum(m, t_ref[t])
        o_ref[...] = m

    out = pl.pallas_call(
        kernel,
        out_shape=jax.ShapeDtypeStruct((rows_p, 128), x.dtype),
        grid_spec=pltpu.PrefetchScalarGridSpec(
            num_scalar_prefetch=0,
            grid=(rows_p // tm,),
            in_specs=[pl.BlockSpec((9, tm, 128), lambda i: (0, i, 0))],
            out_specs=pl.BlockSpec((tm, 128), lambda i: (i, 0)),
        ),
        compiler_params=pltpu.CompilerParams(dimension_semantics=("parallel",)),
    )(stacked)
    return out.reshape(-1)[:total].reshape(N, Ho, Wo, C)


# ---------------------------------------------------------------------------
# Deterministic synthetic parameters, preprocessed at init time:
#   weight -> (kh*kw*cin, cout) matrix, BN scale folded in, zero-padded, bf16.
# ---------------------------------------------------------------------------
def _prep_conv(wkey, bnkey, cout, cin, kh, kw):
    fan_in = cin * kh * kw
    w = jax.random.normal(wkey, (cout, cin, kh, kw), jnp.float32) / jnp.sqrt(fan_in)
    k1, k2 = jax.random.split(bnkey)
    gamma = 1.0 + 0.05 * jax.random.normal(k1, (cout,), jnp.float32)
    beta = 0.05 * jax.random.normal(k2, (cout,), jnp.float32)
    running_mean = jnp.zeros((cout,), jnp.float32)
    running_var = jnp.ones((cout,), jnp.float32)
    scale = gamma / jnp.sqrt(running_var + EPS)
    bias = beta - running_mean * scale
    # tap-major (di, dj, c fastest) to match _im2col column ordering
    b = jnp.transpose(w, (2, 3, 1, 0)).reshape(kh * kw * cin, cout)
    b = b * scale[None, :]                                # fold BN scale into weights
    K = kh * kw * cin
    Kp, Np = _round_up(K, 128), _round_up(cout, 128)
    b_pad = jnp.pad(b, ((0, Kp - K), (0, Np - cout))).astype(jnp.bfloat16)
    bias_pad = jnp.pad(bias, (0, Np - cout)).reshape(1, Np).astype(jnp.float32)
    return (b_pad, bias_pad, cout, kh, kw)


def init_params(key):
    keys = iter(jax.random.split(key, 220))
    params = {"stem": _prep_conv(next(keys), next(keys), 64, 3, 7, 7)}

    inplanes = 64
    layers = []
    for planes, blocks, stride in [(64, 3, 1), (128, 4, 2), (256, 6, 2), (512, 3, 2)]:
        blocks_p = []
        for bidx in range(blocks):
            st = stride if bidx == 0 else 1
            blk = {"stride": st}
            blk["conv1"] = _prep_conv(next(keys), next(keys), planes, inplanes, 1, 1)
            blk["conv2"] = _prep_conv(next(keys), next(keys), planes, planes, 3, 3)
            blk["conv3"] = _prep_conv(next(keys), next(keys), planes * 4, planes, 1, 1)
            if bidx == 0:  # make_layer always attaches a downsample on the first block
                blk["down"] = _prep_conv(next(keys), next(keys), planes * 4, inplanes, 1, 1)
                inplanes = planes * 4
            blocks_p.append(blk)
        layers.append(blocks_p)
    params["layers"] = layers
    return params


# ---------------------------------------------------------------------------
# Forward pass
# ---------------------------------------------------------------------------
def bottleneck_forward(x, blk):
    stride = blk["stride"]
    out = conv_bn_act(x, blk["conv1"], stride=1, padding=0, relu=True)
    out = conv_bn_act(out, blk["conv2"], stride=stride, padding=1, relu=True)
    if "down" in blk:
        identity = conv_bn_act(x, blk["down"], stride=stride, padding=0, relu=False)
    else:
        identity = x
    # bn3(conv3(out)) + identity, then ReLU -- fused in the matmul epilogue
    return conv_bn_act(out, blk["conv3"], stride=1, padding=0, relu=True,
                       residual=identity)


def resnet_forward(x_nchw, params):
    x = jnp.transpose(x_nchw, (0, 2, 3, 1)).astype(jnp.float32)  # NCHW -> NHWC
    x = conv_bn_act(x, params["stem"], stride=2, padding=3, relu=True)
    x = maxpool_3x3_s2(x)
    feats = []
    for layer in params["layers"]:
        for blk in layer:
            x = bottleneck_forward(x, blk)
        feats.append(x)
    # back to NCHW to match the PyTorch module's output convention
    return tuple(jnp.transpose(f, (0, 3, 1, 2)) for f in feats)


if __name__ == "__main__":
    key = jax.random.PRNGKey(0)
    pkey, xkey = jax.random.split(key)
    params = init_params(pkey)
    x = jax.random.normal(xkey, (2, 3, 64, 64), jnp.float32)

    out2, out3, out4, out5 = jax.block_until_ready(resnet_forward(x, params))

    assert out2.shape == (2, 256, 16, 16), out2.shape
    assert out3.shape == (2, 512, 8, 8), out3.shape
    assert out4.shape == (2, 1024, 4, 4), out4.shape
    assert out5.shape == (2, 2048, 2, 2), out5.shape
    for o in (out2, out3, out4, out5):
        assert bool(jnp.all(jnp.isfinite(o)))
    print("KERNEL_OK")
</pallas_src>

<mosaic_0001>
module attributes {stable_mosaic.version = 11 : i64} {
  func.func @kernel(%arg0: i32, %arg1: i32, %arg2: memref<512x256xbf16, #tpu.memory_space<vmem>>, %arg3: memref<256x128xbf16, #tpu.memory_space<vmem>>, %arg4: memref<1x128xf32, #tpu.memory_space<vmem>>, %arg5: memref<512x128xf32, #tpu.memory_space<vmem>>) attributes {dimension_semantics = [#tpu.dimension_semantics<parallel>, #tpu.dimension_semantics<parallel>], iteration_bounds = array<i64: 4, 1>, scalar_prefetch = 0 : i64, scratch_operands = 0 : i64, tpu.core_type = #tpu.core_type<tc>, window_params = [{transform_indices = @transform_0, window_bounds = array<i64: 512, 256>}, {transform_indices = @transform_1, window_bounds = array<i64: 256, 128>}, {transform_indices = @transform_2, window_bounds = array<i64: 1, 128>}, {transform_indices = @transform_3, window_bounds = array<i64: 512, 128>}]} {
    %c0 = arith.constant 0 : index
    %c0_0 = arith.constant 0 : index
    %0 = vector.load %arg2[%c0, %c0_0] : memref<512x256xbf16, #tpu.memory_space<vmem>>, vector<512x256xbf16>
    %c0_1 = arith.constant 0 : index
    %c0_2 = arith.constant 0 : index
    %1 = vector.load %arg3[%c0_1, %c0_2] : memref<256x128xbf16, #tpu.memory_space<vmem>>, vector<256x128xbf16>
    %cst = arith.constant dense<0.000000e+00> : vector<512x128xf32>
    %2 = tpu.matmul %0, %1, %cst {dimension_numbers = #tpu.dot_dimension_numbers<[1], [0], [0], [1], [0, 0, 1, 1], [], []>} : vector<512x256xbf16>, vector<256x128xbf16>, vector<512x128xf32> -> vector<512x128xf32>
    %c0_3 = arith.constant 0 : index
    %c0_4 = arith.constant 0 : index
    %3 = vector.load %arg4[%c0_3, %c0_4] : memref<1x128xf32, #tpu.memory_space<vmem>>, vector<1x128xf32>
    %4 = vector.broadcast %3 : vector<1x128xf32> to vector<512x128xf32>
    %5 = arith.addf %2, %4 : vector<512x128xf32>
    %cst_5 = arith.constant 0.000000e+00 : f32
    %6 = vector.broadcast %cst_5 : f32 to vector<512x128xf32>
    %7 = arith.maximumf %5, %6 : vector<512x128xf32>
    %c0_6 = arith.constant 0 : index
    %c0_7 = arith.constant 0 : index
    %8 = vector.load %arg5[%c0_6, %c0_7] : memref<512x128xf32, #tpu.memory_space<vmem>>, vector<512x128xf32>
    tpu.vector_store %arg5[%c0_6, %c0_7], %7 {strides = array<i32>} : memref<512x128xf32, #tpu.memory_space<vmem>>, vector<512x128xf32>,
    return
  }
  func.func @transform_0(%arg0: i32, %arg1: i32) -> (i32, i32) {
    %c0_i32 = arith.constant 0 : i32
    %c0_i32_0 = arith.constant 0 : i32
    return %arg0, %c0_i32 : i32, i32
  }
  func.func @transform_1(%arg0: i32, %arg1: i32) -> (i32, i32) {
    %c0_i32 = arith.constant 0 : i32
    %c0_i32_0 = arith.constant 0 : i32
    return %c0_i32, %arg1 : i32, i32
  }
  func.func @transform_2(%arg0: i32, %arg1: i32) -> (i32, i32) {
    %c0_i32 = arith.constant 0 : i32
    %c0_i32_0 = arith.constant 0 : i32
    return %c0_i32, %arg1 : i32, i32
  }
  func.func @transform_3(%arg0: i32, %arg1: i32) -> (i32, i32) {
    %c0_i32 = arith.constant 0 : i32
    return %arg0, %arg1 : i32, i32
  }
}

</mosaic_0001>

<bundles_post_ra>
// kernel: fused_matmul_bias.1
= control target key start
LH: loop header
LB: loop body
LE: loop exit
PB: predicated region body
PF: predicated region fallthrough
CT: control target
= control target key end

     0   :  { %s1577_s12 = smov 0   ;;  %s1579_s13 = smov 0   ;;  %s1898_s0 = inlined_call_operand.vmem [shape: bf16[2048,256], index: 0, kind: input, shape index: {}]   ;;  %s1899_s1 = inlined_call_operand.vmem [shape: bf16[256,128], index: 1, kind: input, shape index: {}]   ;;  %s1900_s2 = inlined_call_operand.vmem [shape: f32[1,128], index: 2, kind: input, shape index: {}]   ;;  %s1901_s3 = inlined_call_operand.vmem [shape: f32[2048,128], index: 3, kind: output, shape index: {}]  }
   0x1   :  { %s1581_s14 = smov 0  }
   0x2 LB: > { %s25_s15 = sadd.s32 1, %s1550_s13  ;;  %p1273_p0 = scmp.ge.s32.totalorder %s1554_s14, 1  ;;  %s1554_s14 = sphi %s1581_s14, %s13_s14   ;;  %s1550_s13 = sphi %s1579_s13, %s1903_s13   ;;  %s1546_s12 = sphi %s1577_s12, %s1902_s12  }
   0x3   : > { %p27_p1 = scmp.ge.s32.totalorder %s25_s15, 4  ;;  %p170_p2 = scmp.lt.s32.totalorder %s1554_s14, 5 }
   0x5   : > { %s1905_s15 = smov (%p27_p1, %s25_s15), 0  ;;  %p171_p3 = pnand %p1273_p0, %p170_p2 }
   0x6   : > { %v1420_v0 = vld [vmem:[%s1899_s1] sm:$0xff] (!%p171_p3)   ;;  %v1556_v1 = vmov (!%p171_p3), 0   ;;  %s1274_s18 = sshll.u32 (!%p171_p3), %s1546_s12, 6  ;;  %v1421_v2 = vld [vmem:[%s1899_s1 + $0x8] sm:$0xff] (!%p171_p3)   ;;  %v1422_v3 = vld [vmem:[%s1899_s1 + $0x10] sm:$0xff] (!%p171_p3)  }
   0x7   : > { %174 = sbr.rel (%p171_p3) target bundleno = 410 (0x19a), region = 32  ;;  %748 = vmatprep.subr.bf16.mxu0 (!%p171_p3), %v1556_v1  ;;  %1363 = vmatprep.subr.bf16.mxu1 (!%p171_p3), %v1556_v1  ;;  %p206_p4 = scmp.lt.s32.totalorder (!%p171_p3), %s1274_s18, 255  ;;  %v1423_v4 = vld [vmem:[%s1899_s1 + $0x18] sm:$0xff] (!%p171_p3)   ;;  %v1424_v5 = vld [vmem:[%s1899_s1 + $0x20] sm:$0xff] (!%p171_p3)   ;;  %v1425_v7 = vld [vmem:[%s1899_s1 + $0x28] sm:$0xff] (!%p171_p3)  }
   0x8   : > { %749 = vmatpush1.bf16.msra.mxu0 (!%p171_p3), %v1420_v0  ;;  %1379 = vmatpush1.bf16.msra.mxu1 (!%p171_p3), %v1420_v0  ;;  %v1426_v9 = vld [vmem:[%s1899_s1 + $0x30] sm:$0xff] (!%p171_p3)   ;;  %v1427_v10 = vld [vmem:[%s1899_s1 + $0x38] sm:$0xff] (!%p171_p3)   ;;  %v1428_v11 = vld [vmem:[%s1899_s1 + $0x40] sm:$0xff] (!%p171_p3)  }
   0x9   : > { %750 = vmatprep.subr.bf16.mxu0 (!%p171_p3), %v1556_v1  ;;  %1364 = vmatprep.subr.bf16.mxu1 (!%p171_p3), %v1556_v1  ;;  %v1429_v12 = vld [vmem:[%s1899_s1 + $0x48] sm:$0xff] (!%p171_p3)   ;;  %v1430_v13 = vld [vmem:[%s1899_s1 + $0x50] sm:$0xff] (!%p171_p3)   ;;  %v1431_v14 = vld [vmem:[%s1899_s1 + $0x58] sm:$0xff] (!%p171_p3)  }
   0xa   : > { %v1432_v15 = vld [vmem:[%s1899_s1 + $0x60] sm:$0xff] (!%p171_p3)   ;;  %v1433_v16 = vld [vmem:[%s1899_s1 + $0x68] sm:$0xff] (!%p171_p3)   ;;  %v1434_v17 = vld [vmem:[%s1899_s1 + $0x70] sm:$0xff] (!%p171_p3)  }
   0xb   : > { %v1435_v18 = vld [vmem:[%s1899_s1 + $0x78] sm:$0xff] (!%p171_p3)  }
   0xc   : > { %751 = vmatpush1.bf16.msra.mxu0 (!%p171_p3), %v1421_v2  ;;  %1380 = vmatpush1.bf16.msra.mxu1 (!%p171_p3), %v1421_v2 }
   0xd   : > { %752 = vmatprep.subr.bf16.mxu0 (!%p171_p3), %v1556_v1  ;;  %1365 = vmatprep.subr.bf16.mxu1 (!%p171_p3), %v1556_v1 }
   0xe   : > { %s1907_s18 = smov (!%p206_p4, %s1274_s18), 255 }
   0xf   : > { %s1362_s25 = sshll.u32 %s1907_s18, 3 }
  0x10   : > { %753 = vmatpush1.bf16.msra.mxu0 %v1422_v3  ;;  %1381 = vmatpush1.bf16.msra.mxu1 %v1422_v3  ;;  %s1626_s30 = scalar_lea.vmem %s1898_s0, %s1362_s25 }
  0x11   : > { %754 = vmatprep.subr.bf16.mxu0 %v1556_v1  ;;  %1366 = vmatprep.subr.bf16.mxu1 %v1556_v1  ;;  %v1438_v6 = vld [vmem:[%s1626_s30 + $0x4] ss:$8 sps:$4 sm:$0xff]   ;;  %v1436_v19 = vld [vmem:[%s1626_s30] ss:$8 sps:$4 sm:$0xff]   ;;  %v1442_v21 = vld [vmem:[%s1626_s30 + $0x14] ss:$8 sps:$4 sm:$0xff]  }
  0x12   : > { %v1441_v8 = vld [vmem:[%s1626_s30 + $0x104] ss:$8 sps:$4 sm:$0xff]   ;;  %780 = vmatprep.mubr.bf16.mxu0 %v1438_v6  ;;  %v1439_v20 = vld [vmem:[%s1626_s30 + $0x100] ss:$8 sps:$4 sm:$0xff]   ;;  %v1444_v22 = vld [vmem:[%s1626_s30 + $0x114] ss:$8 sps:$4 sm:$0xff]  }
  0x13   : > { %908 = vmatprep.mubr.bf16.mxu1 %v1441_v8  ;;  %v1446_v23 = vld [vmem:[%s1626_s30 + $0x10] ss:$8 sps:$4 sm:$0xff]   ;;  %v1448_v25 = vld [vmem:[%s1626_s30 + $0x24] ss:$8 sps:$4 sm:$0xff]   ;;  %v1452_v27 = vld [vmem:[%s1626_s30 + $0x20] ss:$8 sps:$4 sm:$0xff]  }
  0x14   : > { %755 = vmatpush1.bf16.msra.mxu0 %v1423_v4  ;;  %1382 = vmatpush1.bf16.msra.mxu1 %v1423_v4  ;;  %v1447_v24 = vld [vmem:[%s1626_s30 + $0x110] ss:$8 sps:$4 sm:$0xff]   ;;  %v1450_v26 = vld [vmem:[%s1626_s30 + $0x124] ss:$8 sps:$4 sm:$0xff]   ;;  %v1453_v28 = vld [vmem:[%s1626_s30 + $0x120] ss:$8 sps:$4 sm:$0xff]  }
  0x15   : > { %756 = vmatprep.subr.bf16.mxu0 %v1556_v1  ;;  %1367 = vmatprep.subr.bf16.mxu1 %v1556_v1  ;;  %v1454_v29 = vld [vmem:[%s1626_s30 + $0x34] ss:$8 sps:$4 sm:$0xff]   ;;  %v1458_v31 = vld [vmem:[%s1626_s30 + $0x30] ss:$8 sps:$4 sm:$0xff]   ;;  %v1460_v33 = vld [vmem:[%s1626_s30 + $0x44] ss:$8 sps:$4 sm:$0xff]  }
  0x16   : > { %v1456_v30 = vld [vmem:[%s1626_s30 + $0x134] ss:$8 sps:$4 sm:$0xff]   ;;  %v1459_v32 = vld [vmem:[%s1626_s30 + $0x130] ss:$8 sps:$4 sm:$0xff]   ;;  %v1462_v34 = vld [vmem:[%s1626_s30 + $0x144] ss:$8 sps:$4 sm:$0xff]  }
  0x17   : > { %v1464_v35 = vld [vmem:[%s1626_s30 + $0x40] ss:$8 sps:$4 sm:$0xff]   ;;  %v1466_v37 = vld [vmem:[%s1626_s30 + $0x54] ss:$8 sps:$4 sm:$0xff]   ;;  %v1470_v39 = vld [vmem:[%s1626_s30 + $0x50] ss:$8 sps:$4 sm:$0xff]  }
  0x18   : > { %757 = vmatpush1.bf16.msra.mxu0 %v1424_v5  ;;  %1383 = vmatpush1.bf16.msra.mxu1 %v1424_v5  ;;  %v1465_v36 = vld [vmem:[%s1626_s30 + $0x140] ss:$8 sps:$4 sm:$0xff]   ;;  %v1468_v38 = vld [vmem:[%s1626_s30 + $0x154] ss:$8 sps:$4 sm:$0xff]   ;;  %v1471_v40 = vld [vmem:[%s1626_s30 + $0x150] ss:$8 sps:$4 sm:$0xff]  }
  0x19   : > { %758 = vmatprep.subr.bf16.mxu0 %v1556_v1  ;;  %1368 = vmatprep.subr.bf16.mxu1 %v1556_v1  ;;  %v1472_v41 = vld [vmem:[%s1626_s30 + $0x64] ss:$8 sps:$4 sm:$0xff]   ;;  %v1476_v43 = vld [vmem:[%s1626_s30 + $0x60] ss:$8 sps:$4 sm:$0xff]   ;;  %v1478_v45 = vld [vmem:[%s1626_s30 + $0x74] ss:$8 sps:$4 sm:$0xff]  }
  0x1a   : > { %v1474_v42 = vld [vmem:[%s1626_s30 + $0x164] ss:$8 sps:$4 sm:$0xff]   ;;  %v1477_v44 = vld [vmem:[%s1626_s30 + $0x160] ss:$8 sps:$4 sm:$0xff]   ;;  %v1480_v46 = vld [vmem:[%s1626_s30 + $0x174] ss:$8 sps:$4 sm:$0xff]  }
  0x1b   : > { %v1482_v47 = vld [vmem:[%s1626_s30 + $0x70] ss:$8 sps:$4 sm:$0xff]   ;;  %v1484_v49 = vld [vmem:[%s1626_s30 + $0x84] ss:$8 sps:$4 sm:$0xff]   ;;  %v1488_v51 = vld [vmem:[%s1626_s30 + $0x80] ss:$8 sps:$4 sm:$0xff]  }
  0x1c   : > { %759 = vmatpush1.bf16.msra.mxu0 %v1425_v7  ;;  %1384 = vmatpush1.bf16.msra.mxu1 %v1425_v7  ;;  %v1483_v48 = vld [vmem:[%s1626_s30 + $0x170] ss:$8 sps:$4 sm:$0xff]   ;;  %v1486_v50 = vld [vmem:[%s1626_s30 + $0x184] ss:$8 sps:$4 sm:$0xff]   ;;  %v1489_v52 = vld [vmem:[%s1626_s30 + $0x180] ss:$8 sps:$4 sm:$0xff]  }
  0x1d   : > { %760 = vmatprep.subr.bf16.mxu0 %v1556_v1  ;;  %1369 = vmatprep.subr.bf16.mxu1 %v1556_v1  ;;  %v1490_v53 = vld [vmem:[%s1626_s30 + $0x94] ss:$8 sps:$4 sm:$0xff]   ;;  %v1494_v55 = vld [vmem:[%s1626_s30 + $0x90] ss:$8 sps:$4 sm:$0xff]   ;;  %v1496_v57 = vld [vmem:[%s1626_s30 + $0xa4] ss:$8 sps:$4 sm:$0xff]  }
  0x1e   : > { %v1492_v54 = vld [vmem:[%s1626_s30 + $0x194] ss:$8 sps:$4 sm:$0xff]   ;;  %v1495_v56 = vld [vmem:[%s1626_s30 + $0x190] ss:$8 sps:$4 sm:$0xff]   ;;  %v1498_v58 = vld [vmem:[%s1626_s30 + $0x1a4] ss:$8 sps:$4 sm:$0xff]  }
  0x1f   : > { %v1500_v59 = vld [vmem:[%s1626_s30 + $0xa0] ss:$8 sps:$4 sm:$0xff]   ;;  %v1502_v61 = vld [vmem:[%s1626_s30 + $0xb4] ss:$8 sps:$4 sm:$0xff]   ;;  %v1506_v63 = vld [vmem:[%s1626_s30 + $0xb0] ss:$8 sps:$4 sm:$0xff]  }
  0x20   : > { %761 = vmatpush1.bf16.msra.mxu0 %v1426_v9  ;;  %1385 = vmatpush1.bf16.msra.mxu1 %v1426_v9  ;;  %v1501_v60 = vld [vmem:[%s1626_s30 + $0x1a0] ss:$8 sps:$4 sm:$0xff]   ;;  %v1504_v62 = vld [vmem:[%s1626_s30 + $0x1b4] ss:$8 sps:$4 sm:$0xff]   ;;  %v1507_v0 = vld [vmem:[%s1626_s30 + $0x1b0] ss:$8 sps:$4 sm:$0xff]  }
  0x21   : > { %762 = vmatprep.subr.bf16.mxu0 %v1556_v1  ;;  %1370 = vmatprep.subr.bf16.mxu1 %v1556_v1  ;;  %v1510_v2 = vld [vmem:[%s1626_s30 + $0x1c4] ss:$8 sps:$4 sm:$0xff]   ;;  %v1512_v3 = vld [vmem:[%s1626_s30 + $0xc0] ss:$8 sps:$4 sm:$0xff]   ;;  %v1514_v5 = vld [vmem:[%s1626_s30 + $0xd4] ss:$8 sps:$4 sm:$0xff]  }
  0x22   : > { %v1513_v4 = vld [vmem:[%s1626_s30 + $0x1c0] ss:$8 sps:$4 sm:$0xff]   ;;  %v1516_v6 = vld [vmem:[%s1626_s30 + $0x1d4] ss:$8 sps:$4 sm:$0xff]   ;;  %v1518_v7 = vld [vmem:[%s1626_s30 + $0xd0] ss:$8 sps:$4 sm:$0xff]  }
  0x23   : > { %v1519_v8 = vld [vmem:[%s1626_s30 + $0x1d0] ss:$8 sps:$4 sm:$0xff]   ;;  %v1520_v9 = vld [vmem:[%s1626_s30 + $0xe4] ss:$8 sps:$4 sm:$0xff]  }
  0x24   : > { %763 = vmatpush1.bf16.msra.mxu0 %v1427_v10  ;;  %1386 = vmatpush1.bf16.msra.mxu1 %v1427_v10  ;;  %v1522_v10 = vld [vmem:[%s1626_s30 + $0x1e4] ss:$8 sps:$4 sm:$0xff]  }
  0x25   : > { %764 = vmatprep.subr.bf16.mxu0 %v1556_v1  ;;  %1371 = vmatprep.subr.bf16.mxu1 %v1556_v1 }
  0x28   : > { %765 = vmatpush1.bf16.msra.mxu0 %v1428_v11  ;;  %1387 = vmatpush1.bf16.msra.mxu1 %v1428_v11  ;;  %v1524_v11 = vld [vmem:[%s1626_s30 + $0xe0] ss:$8 sps:$4 sm:$0xff]  }
  0x29   : > { %766 = vmatprep.subr.bf16.mxu0 %v1556_v1  ;;  %1372 = vmatprep.subr.bf16.mxu1 %v1556_v1 }
  0x2c   : > { %767 = vmatpush1.bf16.msra.mxu0 %v1429_v12  ;;  %1388 = vmatpush1.bf16.msra.mxu1 %v1429_v12  ;;  %v1525_v12 = vld [vmem:[%s1626_s30 + $0x1e0] ss:$8 sps:$4 sm:$0xff]  }
  0x2d   : > { %768 = vmatprep.subr.bf16.mxu0 %v1556_v1  ;;  %1373 = vmatprep.subr.bf16.mxu1 %v1556_v1 }
  0x30   : > { %769 = vmatpush1.bf16.msra.mxu0 %v1430_v13  ;;  %1389 = vmatpush1.bf16.msra.mxu1 %v1430_v13  ;;  %v1526_v13 = vld [vmem:[%s1626_s30 + $0xf4] ss:$8 sps:$4 sm:$0xff]  }
  0x31   : > { %770 = vmatprep.subr.bf16.mxu0 %v1556_v1  ;;  %1374 = vmatprep.subr.bf16.mxu1 %v1556_v1 }
  0x34   : > { %771 = vmatpush1.bf16.msra.mxu0 %v1431_v14  ;;  %1390 = vmatpush1.bf16.msra.mxu1 %v1431_v14  ;;  %v1528_v14 = vld [vmem:[%s1626_s30 + $0x1f4] ss:$8 sps:$4 sm:$0xff]  }
  0x35   : > { %772 = vmatprep.subr.bf16.mxu0 %v1556_v1  ;;  %1375 = vmatprep.subr.bf16.mxu1 %v1556_v1 }
  0x38   : > { %773 = vmatpush1.bf16.msra.mxu0 %v1432_v15  ;;  %1391 = vmatpush1.bf16.msra.mxu1 %v1432_v15  ;;  %v1530_v15 = vld [vmem:[%s1626_s30 + $0xf0] ss:$8 sps:$4 sm:$0xff]  }
  0x39   : > { %774 = vmatprep.subr.bf16.mxu0 %v1556_v1  ;;  %1376 = vmatprep.subr.bf16.mxu1 %v1556_v1 }
  0x3c   : > { %775 = vmatpush1.bf16.msra.mxu0 %v1433_v16  ;;  %1392 = vmatpush1.bf16.msra.mxu1 %v1433_v16  ;;  %v1531_v16 = vld [vmem:[%s1626_s30 + $0x1f0] ss:$8 sps:$4 sm:$0xff]  }
  0x3d   : > { %776 = vmatprep.subr.bf16.mxu0 %v1556_v1  ;;  %1377 = vmatprep.subr.bf16.mxu1 %v1556_v1 }
  0x40   : > { %777 = vmatpush1.bf16.msra.mxu0 %v1434_v17  ;;  %1393 = vmatpush1.bf16.msra.mxu1 %v1434_v17  ;;  %v1752_v17 = vld [vmem:[%s1900_s2] ss:$0 sm:$0xff] }
  0x41   : > { %778 = vmatprep.subr.bf16.mxu0 %v1556_v1  ;;  %1378 = vmatprep.subr.bf16.mxu1 %v1556_v1  ;;  %v1508_v1 = vld [vmem:[%s1626_s30 + $0xc4] ss:$8 sps:$4 sm:$0xff]   ;;  %s1761_s30 = scalar_lea.vmem %s1901_s3, %s1362_s25 }
  0x44   : > { %779 = vmatpush1.bf16.msra.mxu0 %v1435_v18  ;;  %1394 = vmatpush1.bf16.msra.mxu1 %v1435_v18 }
  0x47   : > { %781 = vmatmul.mubr.bf16.vlgmr.msra.gmra.mrb[0].mxu0 %v1436_v19  ;;  %909 = vmatmul.mubr.bf16.vlgmr.msra.gmra.mrb[0].mxu1 %v1439_v20 }
  0x48   : > { %788 = vmatprep.mubr.bf16.mxu0 %v1442_v21  ;;  %916 = vmatprep.mubr.bf16.mxu1 %v1444_v22 }
  0x4f   : > { %789 = vmatmul.mubr.bf16.gmra.mrb[4].mxu0 %v1446_v23  ;;  %917 = vmatmul.mubr.bf16.gmra.mrb[4].mxu1 %v1447_v24 }
  0x50   : > { %796 = vmatprep.mubr.bf16.mxu0 %v1448_v25  ;;  %924 = vmatprep.mubr.bf16.mxu1 %v1450_v26 }
  0x57   : > { %797 = vmatmul.mubr.bf16.gmra.mrb[8].mxu0 %v1452_v27  ;;  %925 = vmatmul.mubr.bf16.gmra.mrb[8].mxu1 %v1453_v28 }
  0x58   : > { %804 = vmatprep.mubr.bf16.mxu0 %v1454_v29  ;;  %932 = vmatprep.mubr.bf16.mxu1 %v1456_v30 }
  0x5f   : > { %805 = vmatmul.mubr.bf16.gmra.mrb[12].mxu0 %v1458_v31  ;;  %933 = vmatmul.mubr.bf16.gmra.mrb[12].mxu1 %v1459_v32 }
  0x60   : > { %812 = vmatprep.mubr.bf16.mxu0 %v1460_v33  ;;  %940 = vmatprep.mubr.bf16.mxu1 %v1462_v34 }
  0x67   : > { %813 = vmatmul.mubr.bf16.gmra.mrb[16].mxu0 %v1464_v35  ;;  %941 = vmatmul.mubr.bf16.gmra.mrb[16].mxu1 %v1465_v36 }
  0x68   : > { %820 = vmatprep.mubr.bf16.mxu0 %v1466_v37  ;;  %948 = vmatprep.mubr.bf16.mxu1 %v1468_v38 }
  0x6f   : > { %821 = vmatmul.mubr.bf16.gmra.mrb[20].mxu0 %v1470_v39  ;;  %949 = vmatmul.mubr.bf16.gmra.mrb[20].mxu1 %v1471_v40 }
  0x70   : > { %828 = vmatprep.mubr.bf16.mxu0 %v1472_v41  ;;  %956 = vmatprep.mubr.bf16.mxu1 %v1474_v42 }
  0x77   : > { %829 = vmatmul.mubr.bf16.gmra.mrb[24].mxu0 %v1476_v43  ;;  %957 = vmatmul.mubr.bf16.gmra.mrb[24].mxu1 %v1477_v44 }
  0x78   : > { %836 = vmatprep.mubr.bf16.mxu0 %v1478_v45  ;;  %964 = vmatprep.mubr.bf16.mxu1 %v1480_v46 }
  0x7f   : > { %837 = vmatmul.mubr.bf16.gmra.mrb[28].mxu0 %v1482_v47  ;;  %965 = vmatmul.mubr.bf16.gmra.mrb[28].mxu1 %v1483_v48 }
  0x80   : > { %844 = vmatprep.mubr.bf16.mxu0 %v1484_v49  ;;  %972 = vmatprep.mubr.bf16.mxu1 %v1486_v50 }
  0x87   : > { %845 = vmatmul.mubr.bf16.gmra.mrb[32].mxu0 %v1488_v51  ;;  %973 = vmatmul.mubr.bf16.gmra.mrb[32].mxu1 %v1489_v52 }
  0x88   : > { %852 = vmatprep.mubr.bf16.mxu0 %v1490_v53  ;;  %980 = vmatprep.mubr.bf16.mxu1 %v1492_v54 }
  0x8f   : > { %853 = vmatmul.mubr.bf16.gmra.mrb[36].mxu0 %v1494_v55  ;;  %981 = vmatmul.mubr.bf16.gmra.mrb[36].mxu1 %v1495_v56 }
  0x90   : > { %860 = vmatprep.mubr.bf16.mxu0 %v1496_v57  ;;  %988 = vmatprep.mubr.bf16.mxu1 %v1498_v58 }
  0x97   : > { %861 = vmatmul.mubr.bf16.gmra.mrb[40].mxu0 %v1500_v59  ;;  %989 = vmatmul.mubr.bf16.gmra.mrb[40].mxu1 %v1501_v60 }
  0x98   : > { %868 = vmatprep.mubr.bf16.mxu0 %v1502_v61  ;;  %996 = vmatprep.mubr.bf16.mxu1 %v1504_v62 }
  0x9f   : > { %869 = vmatmul.mubr.bf16.gmra.mrb[44].mxu0 %v1506_v63  ;;  %997 = vmatmul.mubr.bf16.gmra.mrb[44].mxu1 %v1507_v0 }
  0xa0   : > { %876 = vmatprep.mubr.bf16.mxu0 %v1508_v1  ;;  %1004 = vmatprep.mubr.bf16.mxu1 %v1510_v2 }
  0xa7   : > { %877 = vmatmul.mubr.bf16.gmra.mrb[48].mxu0 %v1512_v3  ;;  %1005 = vmatmul.mubr.bf16.gmra.mrb[48].mxu1 %v1513_v4 }
  0xa8   : > { %884 = vmatprep.mubr.bf16.mxu0 %v1514_v5  ;;  %1012 = vmatprep.mubr.bf16.mxu1 %v1516_v6 }
  0xaf   : > { %885 = vmatmul.mubr.bf16.gmra.mrb[52].mxu0 %v1518_v7  ;;  %1013 = vmatmul.mubr.bf16.gmra.mrb[52].mxu1 %v1519_v8 }
  0xb0   : > { %892 = vmatprep.mubr.bf16.mxu0 %v1520_v9  ;;  %1020 = vmatprep.mubr.bf16.mxu1 %v1522_v10 }
  0xb7   : > { %893 = vmatmul.mubr.bf16.gmra.mrb[56].mxu0 %v1524_v11  ;;  %1021 = vmatmul.mubr.bf16.gmra.mrb[56].mxu1 %v1525_v12 }
  0xb8   : > { %900 = vmatprep.mubr.bf16.mxu0 %v1526_v13  ;;  %1028 = vmatprep.mubr.bf16.mxu1 %v1528_v14 }
  0xbf   : > { %901 = vmatmul.mubr.bf16.gmra.mrb[60].mxu0 %v1530_v15  ;;  %1029 = vmatmul.mubr.bf16.gmra.mrb[60].mxu1 %v1531_v16 }
 0x11a   : > { %v782_v18 = vpop.f32.mrb[0].mxu0  ;;  %v910_v19 = vpop.f32.mrb[0].mxu1 }
 0x11b   : > { %v783_v20 = vadd.f32 %v1752_v17, %v782_v18  ;;  %v911_v21 = vadd.f32 %v1752_v17, %v910_v19  ;;  %v784_v22 = vpop.f32.mrb[1].mxu0  ;;  %v912_v23 = vpop.f32.mrb[1].mxu1 }
 0x11c   : > { %v785_v24 = vpop.f32.mrb[2].mxu0  ;;  %v913_v25 = vpop.f32.mrb[2].mxu1 }
 0x11d   : > { %v1037_v26 = vmax.f32 %v783_v20, 0.0  ;;  %v1069_v27 = vmax.f32 %v911_v21, 0.0  ;;  %v786_v28 = vadd.f32 %v1752_v17, %v785_v24  ;;  %v914_v29 = vadd.f32 %v1752_v17, %v913_v25  ;;  %v787_v30 = vpop.f32.mrb[3].mxu0  ;;  %v915_v31 = vpop.f32.mrb[3].mxu1 }
 0x11f   : > { %1101 = vst [vmem:[%s1761_s30] sm:$0xff] %v1037_v26  ;;  %1133 = vst [vmem:[%s1761_s30 + $0x100] sm:$0xff] %v1069_v27  ;;  %v1038_v32 = vmax.f32 %v786_v28, 0.0  ;;  %v1070_v33 = vmax.f32 %v914_v29, 0.0 }
 0x121   : > { %1102 = vst [vmem:[%s1761_s30 + $0x8] sm:$0xff] %v1038_v32  ;;  %1134 = vst [vmem:[%s1761_s30 + $0x108] sm:$0xff] %v1070_v33 }
 0x122   : > { %v790_v34 = vpop.f32.mrb[4].mxu0  ;;  %v918_v35 = vpop.f32.mrb[4].mxu1 }
 0x123   : > { %v791_v36 = vadd.f32 %v1752_v17, %v790_v34  ;;  %v919_v37 = vadd.f32 %v1752_v17, %v918_v35  ;;  %v792_v38 = vpop.f32.mrb[5].mxu0  ;;  %v920_v39 = vpop.f32.mrb[5].mxu1 }
 0x124   : > { %v793_v40 = vpop.f32.mrb[6].mxu0  ;;  %v921_v41 = vpop.f32.mrb[6].mxu1 }
 0x125   : > { %v1039_v42 = vmax.f32 %v791_v36, 0.0  ;;  %v1071_v43 = vmax.f32 %v919_v37, 0.0  ;;  %v794_v44 = vadd.f32 %v1752_v17, %v793_v40  ;;  %v922_v45 = vadd.f32 %v1752_v17, %v921_v41  ;;  %v795_v46 = vpop.f32.mrb[7].mxu0  ;;  %v923_v47 = vpop.f32.mrb[7].mxu1 }
 0x127   : > { %1103 = vst [vmem:[%s1761_s30 + $0x10] sm:$0xff] %v1039_v42  ;;  %1135 = vst [vmem:[%s1761_s30 + $0x110] sm:$0xff] %v1071_v43  ;;  %v1040_v48 = vmax.f32 %v794_v44, 0.0  ;;  %v1072_v49 = vmax.f32 %v922_v45, 0.0 }
 0x129   : > { %1104 = vst [vmem:[%s1761_s30 + $0x18] sm:$0xff] %v1040_v48  ;;  %1136 = vst [vmem:[%s1761_s30 + $0x118] sm:$0xff] %v1072_v49 }
 0x12a   : > { %v798_v50 = vpop.f32.mrb[8].mxu0  ;;  %v926_v51 = vpop.f32.mrb[8].mxu1 }
 0x12b   : > { %v799_v52 = vadd.f32 %v1752_v17, %v798_v50  ;;  %v927_v53 = vadd.f32 %v1752_v17, %v926_v51  ;;  %v800_v54 = vpop.f32.mrb[9].mxu0  ;;  %v928_v55 = vpop.f32.mrb[9].mxu1 }
 0x12c   : > { %v801_v56 = vpop.f32.mrb[10].mxu0  ;;  %v929_v57 = vpop.f32.mrb[10].mxu1 }
 0x12d   : > { %v1041_v58 = vmax.f32 %v799_v52, 0.0  ;;  %v1073_v59 = vmax.f32 %v927_v53, 0.0  ;;  %v802_v60 = vadd.f32 %v1752_v17, %v801_v56  ;;  %v930_v61 = vadd.f32 %v1752_v17, %v929_v57  ;;  %v803_v62 = vpop.f32.mrb[11].mxu0  ;;  %v931_v63 = vpop.f32.mrb[11].mxu1 }
 0x12f   : > { %1105 = vst [vmem:[%s1761_s30 + $0x20] sm:$0xff] %v1041_v58  ;;  %1137 = vst [vmem:[%s1761_s30 + $0x120] sm:$0xff] %v1073_v59  ;;  %v1042_v0 = vmax.f32 %v802_v60, 0.0  ;;  %v1074_v1 = vmax.f32 %v930_v61, 0.0 }
 0x131   : > { %1106 = vst [vmem:[%s1761_s30 + $0x28] sm:$0xff] %v1042_v0  ;;  %1138 = vst [vmem:[%s1761_s30 + $0x128] sm:$0xff] %v1074_v1 }
 0x132   : > { %v806_v2 = vpop.f32.mrb[12].mxu0  ;;  %v934_v3 = vpop.f32.mrb[12].mxu1 }
 0x133   : > { %v807_v4 = vadd.f32 %v1752_v17, %v806_v2  ;;  %v935_v5 = vadd.f32 %v1752_v17, %v934_v3  ;;  %v808_v6 = vpop.f32.mrb[13].mxu0  ;;  %v936_v7 = vpop.f32.mrb[13].mxu1 }
 0x134   : > { %v809_v8 = vpop.f32.mrb[14].mxu0  ;;  %v937_v9 = vpop.f32.mrb[14].mxu1 }
 0x135   : > { %v1043_v10 = vmax.f32 %v807_v4, 0.0  ;;  %v1075_v11 = vmax.f32 %v935_v5, 0.0  ;;  %v810_v12 = vadd.f32 %v1752_v17, %v809_v8  ;;  %v938_v13 = vadd.f32 %v1752_v17, %v937_v9  ;;  %v811_v14 = vpop.f32.mrb[15].mxu0  ;;  %v939_v15 = vpop.f32.mrb[15].mxu1 }
 0x137   : > { %1107 = vst [vmem:[%s1761_s30 + $0x30] sm:$0xff] %v1043_v10  ;;  %1139 = vst [vmem:[%s1761_s30 + $0x130] sm:$0xff] %v1075_v11  ;;  %v1044_v16 = vmax.f32 %v810_v12, 0.0  ;;  %v1076_v18 = vmax.f32 %v938_v13, 0.0 }
 0x139   : > { %1108 = vst [vmem:[%s1761_s30 + $0x38] sm:$0xff] %v1044_v16  ;;  %1140 = vst [vmem:[%s1761_s30 + $0x138] sm:$0xff] %v1076_v18 }
 0x13a   : > { %v814_v19 = vpop.f32.mrb[16].mxu0  ;;  %v942_v20 = vpop.f32.mrb[16].mxu1 }
 0x13b   : > { %v815_v21 = vadd.f32 %v1752_v17, %v814_v19  ;;  %v943_v22 = vadd.f32 %v1752_v17, %v942_v20  ;;  %v816_v23 = vpop.f32.mrb[17].mxu0  ;;  %v944_v24 = vpop.f32.mrb[17].mxu1 }
 0x13c   : > { %v817_v25 = vpop.f32.mrb[18].mxu0  ;;  %v945_v26 = vpop.f32.mrb[18].mxu1 }
 0x13d   : > { %v1045_v27 = vmax.f32 %v815_v21, 0.0  ;;  %v1077_v28 = vmax.f32 %v943_v22, 0.0  ;;  %v818_v29 = vadd.f32 %v1752_v17, %v817_v25  ;;  %v946_v30 = vadd.f32 %v1752_v17, %v945_v26  ;;  %v819_v31 = vpop.f32.mrb[19].mxu0  ;;  %v947_v32 = vpop.f32.mrb[19].mxu1 }
 0x13f   : > { %1109 = vst [vmem:[%s1761_s30 + $0x40] sm:$0xff] %v1045_v27  ;;  %1141 = vst [vmem:[%s1761_s30 + $0x140] sm:$0xff] %v1077_v28  ;;  %v1046_v33 = vmax.f32 %v818_v29, 0.0  ;;  %v1078_v34 = vmax.f32 %v946_v30, 0.0 }
 0x141   : > { %1110 = vst [vmem:[%s1761_s30 + $0x48] sm:$0xff] %v1046_v33  ;;  %1142 = vst [vmem:[%s1761_s30 + $0x148] sm:$0xff] %v1078_v34 }
 0x142   : > { %v822_v35 = vpop.f32.mrb[20].mxu0  ;;  %v950_v36 = vpop.f32.mrb[20].mxu1 }
 0x143   : > { %v823_v37 = vadd.f32 %v1752_v17, %v822_v35  ;;  %v951_v38 = vadd.f32 %v1752_v17, %v950_v36  ;;  %v824_v39 = vpop.f32.mrb[21].mxu0  ;;  %v952_v40 = vpop.f32.mrb[21].mxu1 }
 0x144   : > { %v825_v41 = vpop.f32.mrb[22].mxu0  ;;  %v953_v42 = vpop.f32.mrb[22].mxu1 }
 0x145   : > { %v1047_v43 = vmax.f32 %v823_v37, 0.0  ;;  %v1079_v44 = vmax.f32 %v951_v38, 0.0  ;;  %v826_v45 = vadd.f32 %v1752_v17, %v825_v41  ;;  %v954_v46 = vadd.f32 %v1752_v17, %v953_v42  ;;  %v827_v47 = vpop.f32.mrb[23].mxu0  ;;  %v955_v48 = vpop.f32.mrb[23].mxu1 }
 0x147   : > { %1111 = vst [vmem:[%s1761_s30 + $0x50] sm:$0xff] %v1047_v43  ;;  %1143 = vst [vmem:[%s1761_s30 + $0x150] sm:$0xff] %v1079_v44  ;;  %v1048_v49 = vmax.f32 %v826_v45, 0.0  ;;  %v1080_v50 = vmax.f32 %v954_v46, 0.0 }
 0x149   : > { %1112 = vst [vmem:[%s1761_s30 + $0x58] sm:$0xff] %v1048_v49  ;;  %1144 = vst [vmem:[%s1761_s30 + $0x158] sm:$0xff] %v1080_v50 }
 0x14a   : > { %v830_v51 = vpop.f32.mrb[24].mxu0  ;;  %v958_v52 = vpop.f32.mrb[24].mxu1 }
 0x14b   : > { %v831_v53 = vadd.f32 %v1752_v17, %v830_v51  ;;  %v959_v54 = vadd.f32 %v1752_v17, %v958_v52  ;;  %v832_v55 = vpop.f32.mrb[25].mxu0  ;;  %v960_v56 = vpop.f32.mrb[25].mxu1 }
 0x14c   : > { %v833_v57 = vpop.f32.mrb[26].mxu0  ;;  %v961_v58 = vpop.f32.mrb[26].mxu1 }
 0x14d   : > { %v1049_v59 = vmax.f32 %v831_v53, 0.0  ;;  %v1081_v60 = vmax.f32 %v959_v54, 0.0  ;;  %v834_v61 = vadd.f32 %v1752_v17, %v833_v57  ;;  %v962_v62 = vadd.f32 %v1752_v17, %v961_v58  ;;  %v835_v63 = vpop.f32.mrb[27].mxu0  ;;  %v963_v0 = vpop.f32.mrb[27].mxu1 }
 0x14f   : > { %1113 = vst [vmem:[%s1761_s30 + $0x60] sm:$0xff] %v1049_v59  ;;  %1145 = vst [vmem:[%s1761_s30 + $0x160] sm:$0xff] %v1081_v60  ;;  %v1050_v1 = vmax.f32 %v834_v61, 0.0  ;;  %v1082_v2 = vmax.f32 %v962_v62, 0.0 }
 0x151   : > { %1114 = vst [vmem:[%s1761_s30 + $0x68] sm:$0xff] %v1050_v1  ;;  %1146 = vst [vmem:[%s1761_s30 + $0x168] sm:$0xff] %v1082_v2 }
 0x152   : > { %v838_v3 = vpop.f32.mrb[28].mxu0  ;;  %v966_v4 = vpop.f32.mrb[28].mxu1 }
 0x153   : > { %v839_v5 = vadd.f32 %v1752_v17, %v838_v3  ;;  %v967_v6 = vadd.f32 %v1752_v17, %v966_v4  ;;  %v840_v7 = vpop.f32.mrb[29].mxu0  ;;  %v968_v8 = vpop.f32.mrb[29].mxu1 }
 0x154   : > { %v841_v9 = vpop.f32.mrb[30].mxu0  ;;  %v969_v10 = vpop.f32.mrb[30].mxu1 }
 0x155   : > { %v1051_v11 = vmax.f32 %v839_v5, 0.0  ;;  %v1083_v12 = vmax.f32 %v967_v6, 0.0  ;;  %v842_v13 = vadd.f32 %v1752_v17, %v841_v9  ;;  %v970_v14 = vadd.f32 %v1752_v17, %v969_v10  ;;  %v843_v15 = vpop.f32.mrb[31].mxu0  ;;  %v971_v16 = vpop.f32.mrb[31].mxu1 }
 0x157   : > { %1115 = vst [vmem:[%s1761_s30 + $0x70] sm:$0xff] %v1051_v11  ;;  %1147 = vst [vmem:[%s1761_s30 + $0x170] sm:$0xff] %v1083_v12  ;;  %v1052_v18 = vmax.f32 %v842_v13, 0.0  ;;  %v1084_v19 = vmax.f32 %v970_v14, 0.0 }
 0x159   : > { %1116 = vst [vmem:[%s1761_s30 + $0x78] sm:$0xff] %v1052_v18  ;;  %1148 = vst [vmem:[%s1761_s30 + $0x178] sm:$0xff] %v1084_v19 }
 0x15a   : > { %v846_v20 = vpop.f32.mrb[32].mxu0  ;;  %v974_v21 = vpop.f32.mrb[32].mxu1 }
 0x15b   : > { %v847_v22 = vadd.f32 %v1752_v17, %v846_v20  ;;  %v975_v23 = vadd.f32 %v1752_v17, %v974_v21  ;;  %v848_v24 = vpop.f32.mrb[33].mxu0  ;;  %v976_v25 = vpop.f32.mrb[33].mxu1 }
 0x15c   : > { %v849_v26 = vpop.f32.mrb[34].mxu0  ;;  %v977_v27 = vpop.f32.mrb[34].mxu1 }
 0x15d   : > { %v1053_v28 = vmax.f32 %v847_v22, 0.0  ;;  %v1085_v29 = vmax.f32 %v975_v23, 0.0  ;;  %v850_v30 = vadd.f32 %v1752_v17, %v849_v26  ;;  %v978_v31 = vadd.f32 %v1752_v17, %v977_v27  ;;  %v851_v32 = vpop.f32.mrb[35].mxu0  ;;  %v979_v33 = vpop.f32.mrb[35].mxu1 }
 0x15f   : > { %1117 = vst [vmem:[%s1761_s30 + $0x80] sm:$0xff] %v1053_v28  ;;  %1149 = vst [vmem:[%s1761_s30 + $0x180] sm:$0xff] %v1085_v29  ;;  %v1054_v34 = vmax.f32 %v850_v30, 0.0  ;;  %v1086_v35 = vmax.f32 %v978_v31, 0.0 }
 0x161   : > { %1118 = vst [vmem:[%s1761_s30 + $0x88] sm:$0xff] %v1054_v34  ;;  %1150 = vst [vmem:[%s1761_s30 + $0x188] sm:$0xff] %v1086_v35 }
 0x162   : > { %v854_v36 = vpop.f32.mrb[36].mxu0  ;;  %v982_v37 = vpop.f32.mrb[36].mxu1 }
 0x163   : > { %v855_v38 = vadd.f32 %v1752_v17, %v854_v36  ;;  %v983_v39 = vadd.f32 %v1752_v17, %v982_v37  ;;  %v856_v40 = vpop.f32.mrb[37].mxu0  ;;  %v984_v41 = vpop.f32.mrb[37].mxu1 }
 0x164   : > { %v857_v42 = vpop.f32.mrb[38].mxu0  ;;  %v985_v43 = vpop.f32.mrb[38].mxu1 }
 0x165   : > { %v1055_v44 = vmax.f32 %v855_v38, 0.0  ;;  %v1087_v45 = vmax.f32 %v983_v39, 0.0  ;;  %v858_v46 = vadd.f32 %v1752_v17, %v857_v42  ;;  %v986_v47 = vadd.f32 %v1752_v17, %v985_v43  ;;  %v859_v48 = vpop.f32.mrb[39].mxu0  ;;  %v987_v49 = vpop.f32.mrb[39].mxu1 }
 0x167   : > { %1119 = vst [vmem:[%s1761_s30 + $0x90] sm:$0xff] %v1055_v44  ;;  %1151 = vst [vmem:[%s1761_s30 + $0x190] sm:$0xff] %v1087_v45  ;;  %v1056_v50 = vmax.f32 %v858_v46, 0.0  ;;  %v1088_v51 = vmax.f32 %v986_v47, 0.0 }
 0x169   : > { %1120 = vst [vmem:[%s1761_s30 + $0x98] sm:$0xff] %v1056_v50  ;;  %1152 = vst [vmem:[%s1761_s30 + $0x198] sm:$0xff] %v1088_v51 }
 0x16a   : > { %v862_v52 = vpop.f32.mrb[40].mxu0  ;;  %v990_v53 = vpop.f32.mrb[40].mxu1 }
 0x16b   : > { %v863_v54 = vadd.f32 %v1752_v17, %v862_v52  ;;  %v991_v55 = vadd.f32 %v1752_v17, %v990_v53  ;;  %v864_v56 = vpop.f32.mrb[41].mxu0  ;;  %v992_v57 = vpop.f32.mrb[41].mxu1 }
 0x16c   : > { %v865_v58 = vpop.f32.mrb[42].mxu0  ;;  %v993_v59 = vpop.f32.mrb[42].mxu1 }
 0x16d   : > { %v1057_v60 = vmax.f32 %v863_v54, 0.0  ;;  %v1089_v61 = vmax.f32 %v991_v55, 0.0  ;;  %v866_v62 = vadd.f32 %v1752_v17, %v865_v58  ;;  %v994_v63 = vadd.f32 %v1752_v17, %v993_v59  ;;  %v867_v0 = vpop.f32.mrb[43].mxu0  ;;  %v995_v1 = vpop.f32.mrb[43].mxu1 }
 0x16f   : > { %1121 = vst [vmem:[%s1761_s30 + $0xa0] sm:$0xff] %v1057_v60  ;;  %1153 = vst [vmem:[%s1761_s30 + $0x1a0] sm:$0xff] %v1089_v61  ;;  %v1058_v2 = vmax.f32 %v866_v62, 0.0  ;;  %v1090_v3 = vmax.f32 %v994_v63, 0.0 }
 0x171   : > { %1122 = vst [vmem:[%s1761_s30 + $0xa8] sm:$0xff] %v1058_v2  ;;  %1154 = vst [vmem:[%s1761_s30 + $0x1a8] sm:$0xff] %v1090_v3 }
 0x172   : > { %v870_v4 = vpop.f32.mrb[44].mxu0  ;;  %v998_v5 = vpop.f32.mrb[44].mxu1 }
 0x173   : > { %v871_v6 = vadd.f32 %v1752_v17, %v870_v4  ;;  %v999_v7 = vadd.f32 %v1752_v17, %v998_v5  ;;  %v872_v8 = vpop.f32.mrb[45].mxu0  ;;  %v1000_v9 = vpop.f32.mrb[45].mxu1 }
 0x174   : > { %v873_v10 = vpop.f32.mrb[46].mxu0  ;;  %v1001_v11 = vpop.f32.mrb[46].mxu1 }
 0x175   : > { %v1059_v12 = vmax.f32 %v871_v6, 0.0  ;;  %v1091_v13 = vmax.f32 %v999_v7, 0.0  ;;  %v874_v14 = vadd.f32 %v1752_v17, %v873_v10  ;;  %v1002_v15 = vadd.f32 %v1752_v17, %v1001_v11  ;;  %v875_v16 = vpop.f32.mrb[47].mxu0  ;;  %v1003_v18 = vpop.f32.mrb[47].mxu1 }
 0x177   : > { %1123 = vst [vmem:[%s1761_s30 + $0xb0] sm:$0xff] %v1059_v12  ;;  %1155 = vst [vmem:[%s1761_s30 + $0x1b0] sm:$0xff] %v1091_v13  ;;  %v1060_v19 = vmax.f32 %v874_v14, 0.0  ;;  %v1092_v20 = vmax.f32 %v1002_v15, 0.0 }
 0x179   : > { %1124 = vst [vmem:[%s1761_s30 + $0xb8] sm:$0xff] %v1060_v19  ;;  %1156 = vst [vmem:[%s1761_s30 + $0x1b8] sm:$0xff] %v1092_v20 }
 0x17a   : > { %v878_v21 = vpop.f32.mrb[48].mxu0  ;;  %v1006_v22 = vpop.f32.mrb[48].mxu1 }
 0x17b   : > { %v879_v23 = vadd.f32 %v1752_v17, %v878_v21  ;;  %v1007_v24 = vadd.f32 %v1752_v17, %v1006_v22  ;;  %v880_v25 = vpop.f32.mrb[49].mxu0  ;;  %v1008_v26 = vpop.f32.mrb[49].mxu1 }
 0x17c   : > { %v881_v27 = vpop.f32.mrb[50].mxu0  ;;  %v1009_v28 = vpop.f32.mrb[50].mxu1 }
 0x17d   : > { %v1061_v29 = vmax.f32 %v879_v23, 0.0  ;;  %v1093_v30 = vmax.f32 %v1007_v24, 0.0  ;;  %v882_v31 = vadd.f32 %v1752_v17, %v881_v27  ;;  %v1010_v32 = vadd.f32 %v1752_v17, %v1009_v28  ;;  %v883_v33 = vpop.f32.mrb[51].mxu0  ;;  %v1011_v34 = vpop.f32.mrb[51].mxu1 }
 0x17f   : > { %1125 = vst [vmem:[%s1761_s30 + $0xc0] sm:$0xff] %v1061_v29  ;;  %1157 = vst [vmem:[%s1761_s30 + $0x1c0] sm:$0xff] %v1093_v30  ;;  %v1062_v35 = vmax.f32 %v882_v31, 0.0  ;;  %v1094_v36 = vmax.f32 %v1010_v32, 0.0 }
 0x181   : > { %1126 = vst [vmem:[%s1761_s30 + $0xc8] sm:$0xff] %v1062_v35  ;;  %1158 = vst [vmem:[%s1761_s30 + $0x1c8] sm:$0xff] %v1094_v36 }
 0x182   : > { %v886_v37 = vpop.f32.mrb[52].mxu0  ;;  %v1014_v38 = vpop.f32.mrb[52].mxu1 }
 0x183   : > { %v887_v39 = vadd.f32 %v1752_v17, %v886_v37  ;;  %v1015_v40 = vadd.f32 %v1752_v17, %v1014_v38  ;;  %v888_v41 = vpop.f32.mrb[53].mxu0  ;;  %v1016_v42 = vpop.f32.mrb[53].mxu1 }
 0x184   : > { %v889_v43 = vpop.f32.mrb[54].mxu0  ;;  %v1017_v44 = vpop.f32.mrb[54].mxu1 }
 0x185   : > { %v1063_v45 = vmax.f32 %v887_v39, 0.0  ;;  %v1095_v46 = vmax.f32 %v1015_v40, 0.0  ;;  %v890_v47 = vadd.f32 %v1752_v17, %v889_v43  ;;  %v1018_v48 = vadd.f32 %v1752_v17, %v1017_v44  ;;  %v891_v49 = vpop.f32.mrb[55].mxu0  ;;  %v1019_v50 = vpop.f32.mrb[55].mxu1 }
 0x187   : > { %1127 = vst [vmem:[%s1761_s30 + $0xd0] sm:$0xff] %v1063_v45  ;;  %1159 = vst [vmem:[%s1761_s30 + $0x1d0] sm:$0xff] %v1095_v46  ;;  %v1064_v51 = vmax.f32 %v890_v47, 0.0  ;;  %v1096_v52 = vmax.f32 %v1018_v48, 0.0 }
 0x189   : > { %1128 = vst [vmem:[%s1761_s30 + $0xd8] sm:$0xff] %v1064_v51  ;;  %1160 = vst [vmem:[%s1761_s30 + $0x1d8] sm:$0xff] %v1096_v52 }
 0x18a   : > { %v894_v53 = vpop.f32.mrb[56].mxu0  ;;  %v1022_v54 = vpop.f32.mrb[56].mxu1 }
 0x18b   : > { %v895_v55 = vadd.f32 %v1752_v17, %v894_v53  ;;  %v1023_v56 = vadd.f32 %v1752_v17, %v1022_v54  ;;  %v896_v57 = vpop.f32.mrb[57].mxu0  ;;  %v1024_v58 = vpop.f32.mrb[57].mxu1 }
 0x18c   : > { %v897_v59 = vpop.f32.mrb[58].mxu0  ;;  %v1025_v60 = vpop.f32.mrb[58].mxu1 }
 0x18d   : > { %v1065_v61 = vmax.f32 %v895_v55, 0.0  ;;  %v1097_v62 = vmax.f32 %v1023_v56, 0.0  ;;  %v898_v63 = vadd.f32 %v1752_v17, %v897_v59  ;;  %v1026_v0 = vadd.f32 %v1752_v17, %v1025_v60  ;;  %v899_v1 = vpop.f32.mrb[59].mxu0  ;;  %v1027_v2 = vpop.f32.mrb[59].mxu1 }
 0x18f   : > { %1129 = vst [vmem:[%s1761_s30 + $0xe0] sm:$0xff] %v1065_v61  ;;  %1161 = vst [vmem:[%s1761_s30 + $0x1e0] sm:$0xff] %v1097_v62  ;;  %v1066_v3 = vmax.f32 %v898_v63, 0.0  ;;  %v1098_v4 = vmax.f32 %v1026_v0, 0.0 }
 0x191   : > { %1130 = vst [vmem:[%s1761_s30 + $0xe8] sm:$0xff] %v1066_v3  ;;  %1162 = vst [vmem:[%s1761_s30 + $0x1e8] sm:$0xff] %v1098_v4 }
 0x192   : > { %v902_v5 = vpop.f32.mrb[60].mxu0  ;;  %v1030_v6 = vpop.f32.mrb[60].mxu1 }
 0x193   : > { %v903_v7 = vadd.f32 %v1752_v17, %v902_v5  ;;  %v1031_v8 = vadd.f32 %v1752_v17, %v1030_v6  ;;  %v904_v9 = vpop.f32.mrb[61].mxu0  ;;  %v1032_v10 = vpop.f32.mrb[61].mxu1 }
 0x194   : > { %v905_v11 = vpop.f32.mrb[62].mxu0  ;;  %v1033_v12 = vpop.f32.mrb[62].mxu1 }
 0x195   : > { %v1067_v13 = vmax.f32 %v903_v7, 0.0  ;;  %v1099_v14 = vmax.f32 %v1031_v8, 0.0  ;;  %v906_v15 = vadd.f32 %v1752_v17, %v905_v11  ;;  %v1034_v16 = vadd.f32 %v1752_v17, %v1033_v12  ;;  %v907_v18 = vpop.f32.mrb[63].mxu0  ;;  %v1035_v19 = vpop.f32.mrb[63].mxu1 }
 0x197   : > { %1131 = vst [vmem:[%s1761_s30 + $0xf0] sm:$0xff] %v1067_v13  ;;  %1163 = vst [vmem:[%s1761_s30 + $0x1f0] sm:$0xff] %v1099_v14  ;;  %v1068_v20 = vmax.f32 %v906_v15, 0.0  ;;  %v1100_v21 = vmax.f32 %v1034_v16, 0.0 }
 0x199   : > { %1132 = vst [vmem:[%s1761_s30 + $0xf8] sm:$0xff] %v1068_v20  ;;  %1164 = vst [vmem:[%s1761_s30 + $0x1f8] sm:$0xff] %v1100_v21 }
 0x19a PF: > { %s13_s14 = sadd.s32 1, %s1554_s14   ;;  %s1902_s12 = smov %s1550_s13 }
 0x19b   : > { %p10_p5 = scmp.ge.s32.totalorder %s13_s14, 6   ;;  %s1903_s13 = smov %s1905_s15 }
 0x19d   :  { %12 = sbr.rel (!%p10_p5) target bundleno = 2 (0x2), region = 68 }

</bundles_post_ra>
